<compile_context>
chip_gen: v6e
topology: v6e:2x2x1
jax: 0.10.0
libtpu: 0.0.40
codegen_flags: <defaults>
</compile_context>

<pallas_src>
import jax
import jax.numpy as jnp
from jax.experimental import pallas as pl
from jax.experimental.pallas import tpu as pltpu


def _encoder_metadata_kernel(x_ref, w_ref, b_ref, o_ref):
    # x_ref: (B, L, C)   w_ref: (k, C, F)   b_ref: (1, F)   o_ref: (B, F)
    B, L, C = x_ref.shape
    k, _, F = w_ref.shape
    L_out = L - k + 1

    bias = b_ref[...]                               # (1, F)
    w = [w_ref[j] for j in range(k)]                # k small (C, F) operands

    rows = []
    for b in range(B):                              # B is tiny & static -> unrolled
        x_b = x_ref[b]                              # (L, C): one clean 2-D load
        # Per-tap accumulated 2-D dots over the channel axis only:
        #   acc[l, f] = sum_j sum_c x_b[l + j, c] * w[j][c, f]
        acc = jnp.dot(x_b[0:L_out, :], w[0], preferred_element_type=jnp.float32)
        for j in range(1, k):
            acc = acc + jnp.dot(
                x_b[j:j + L_out, :], w[j], preferred_element_type=jnp.float32
            )
        # Temporal max first; bias + ReLU are applied afterwards on (1, F).
        rows.append(jnp.max(acc, axis=0, keepdims=True))   # (1, F)

    m = jnp.concatenate(rows, axis=0) if B > 1 else rows[0]    # (B, F)
    o_ref[...] = jnp.maximum(m + bias, 0.0).astype(o_ref.dtype)


def prepare_params(conv_weight, conv_bias):
    """One-time re-layout of PyTorch Conv1d params (hoisted off the fwd path).

    conv_weight: (F, C, k) -> (k, C, F)   (each tap is a ready (C, F) operand)
    conv_bias:   (F,)      -> (1, F)
    """
    F, C, k = conv_weight.shape
    w_taps = jnp.transpose(conv_weight, (2, 1, 0))      # (k, C, F)
    b_2d = conv_bias.reshape(1, F)
    return w_taps, b_2d


def encoder_metadata_forward(metadata, w_taps, b_2d):
    """metadata: (B, L, C) f32; w_taps: (k, C, F); b_2d: (1, F) -> (B, F)."""
    B, L, C = metadata.shape
    k, C2, F = w_taps.shape
    assert C2 == C, "channel mismatch between metadata and conv weights"
    L_out = L - k + 1
    assert L_out >= 1, "kernelSize must be <= sequence length"

    cost = pl.CostEstimate(
        flops=2 * B * L_out * k * C * F,
        transcendentals=0,
        bytes_accessed=(B * L * C + k * C * F + F + B * F) * 4,
    )

    return pl.pallas_call(
        _encoder_metadata_kernel,
        out_shape=jax.ShapeDtypeStruct((B, F), metadata.dtype),
        in_specs=[
            pl.BlockSpec(memory_space=pltpu.MemorySpace.VMEM),
            pl.BlockSpec(memory_space=pltpu.MemorySpace.VMEM),
            pl.BlockSpec(memory_space=pltpu.MemorySpace.VMEM),
        ],
        out_specs=pl.BlockSpec(memory_space=pltpu.MemorySpace.VMEM),
        cost_estimate=cost,
    )(metadata, w_taps, b_2d)


def _reference_forward(metadata, conv_weight, conv_bias):
    # Pure-JAX reference mirroring the PyTorch module (PyTorch weight layout).
    B, L, C = metadata.shape
    F, _, k = conv_weight.shape
    L_out = L - k + 1
    acc = jnp.zeros((B, L_out, F), jnp.float32)
    for j in range(k):
        acc = acc + jnp.einsum(
            "blc,fc->blf", metadata[:, j:j + L_out, :], conv_weight[:, :, j]
        )
    acc = jnp.maximum(acc + conv_bias[None, None, :], 0.0)
    return jnp.max(acc, axis=1)


if __name__ == "__main__":
    # Small shapes consistent with the module:
    #   batch=2, seq=16, oneHotEncoder.getLength()=6, number_filters=8, kernelSize=3
    B, L, C = 2, 16, 6
    F, k = 8, 3

    key = jax.random.PRNGKey(0)
    k_x, k_w, k_b = jax.random.split(key, 3)

    metadata = jax.random.normal(k_x, (B, L, C), dtype=jnp.float32)
    # Deterministic parameter init (PyTorch Conv1d weight layout: (F, C, k)).
    conv_weight = jax.random.normal(k_w, (F, C, k), dtype=jnp.float32) * 0.1
    conv_bias = jax.random.normal(k_b, (F,), dtype=jnp.float32) * 0.1

    # One-time parameter re-layout (hoisted out of the forward path).
    w_taps, b_2d = prepare_params(conv_weight, conv_bias)

    out = encoder_metadata_forward(metadata, w_taps, b_2d)
    out = jax.block_until_ready(out)

    ref = _reference_forward(metadata, conv_weight, conv_bias)
    assert out.shape == (B, F)
    assert jnp.allclose(out, ref, atol=1e-5, rtol=1e-5)

    print("KERNEL_OK")
</pallas_src>

<mosaic_0001>
module attributes {stable_mosaic.version = 11 : i64} {
  func.func @_encoder_metadata_kernel(%arg0: memref<2x16x6xf32, #tpu.memory_space<vmem>>, %arg1: memref<3x6x8xf32, #tpu.memory_space<vmem>>, %arg2: memref<1x8xf32, #tpu.memory_space<vmem>>, %arg3: memref<2x8xf32, #tpu.memory_space<vmem>>) attributes {dimension_semantics = [], scalar_prefetch = 0 : i64, scratch_operands = 0 : i64, tpu.core_type = #tpu.core_type<tc>} {
    %c0 = arith.constant 0 : index
    %c0_0 = arith.constant 0 : index
    %0 = vector.load %arg2[%c0, %c0_0] : memref<1x8xf32, #tpu.memory_space<vmem>>, vector<1x8xf32>
    %c0_1 = arith.constant 0 : index
    %c0_2 = arith.constant 0 : index
    %c0_3 = arith.constant 0 : index
    %1 = vector.load %arg1[%c0_1, %c0_2, %c0_3] : memref<3x6x8xf32, #tpu.memory_space<vmem>>, vector<1x6x8xf32>
    %2 = vector.shape_cast %1 : vector<1x6x8xf32> to vector<6x8xf32>
    %c1 = arith.constant 1 : index
    %c0_4 = arith.constant 0 : index
    %c0_5 = arith.constant 0 : index
    %3 = vector.load %arg1[%c1, %c0_4, %c0_5] : memref<3x6x8xf32, #tpu.memory_space<vmem>>, vector<1x6x8xf32>
    %4 = vector.shape_cast %3 : vector<1x6x8xf32> to vector<6x8xf32>
    %c2 = arith.constant 2 : index
    %c0_6 = arith.constant 0 : index
    %c0_7 = arith.constant 0 : index
    %5 = vector.load %arg1[%c2, %c0_6, %c0_7] : memref<3x6x8xf32, #tpu.memory_space<vmem>>, vector<1x6x8xf32>
    %6 = vector.shape_cast %5 : vector<1x6x8xf32> to vector<6x8xf32>
    %c0_8 = arith.constant 0 : index
    %c0_9 = arith.constant 0 : index
    %c0_10 = arith.constant 0 : index
    %7 = vector.load %arg0[%c0_8, %c0_9, %c0_10] : memref<2x16x6xf32, #tpu.memory_space<vmem>>, vector<1x16x6xf32>
    %8 = vector.shape_cast %7 : vector<1x16x6xf32> to vector<16x6xf32>
    %9 = vector.extract_strided_slice %8 {offsets = [0, 0], sizes = [14, 6], strides = [1, 1]} : vector<16x6xf32> to vector<14x6xf32>
    %cst = arith.constant dense<0.000000e+00> : vector<14x8xf32>
    %10 = tpu.matmul %9, %2, %cst {dimension_numbers = #tpu.dot_dimension_numbers<[1], [0], [0], [1], [0, 0, 1, 1], [], []>} : vector<14x6xf32>, vector<6x8xf32>, vector<14x8xf32> -> vector<14x8xf32>
    %11 = vector.extract_strided_slice %8 {offsets = [1, 0], sizes = [14, 6], strides = [1, 1]} : vector<16x6xf32> to vector<14x6xf32>
    %cst_11 = arith.constant dense<0.000000e+00> : vector<14x8xf32>
    %12 = tpu.matmul %11, %4, %cst_11 {dimension_numbers = #tpu.dot_dimension_numbers<[1], [0], [0], [1], [0, 0, 1, 1], [], []>} : vector<14x6xf32>, vector<6x8xf32>, vector<14x8xf32> -> vector<14x8xf32>
    %13 = arith.addf %10, %12 : vector<14x8xf32>
    %14 = vector.extract_strided_slice %8 {offsets = [2, 0], sizes = [14, 6], strides = [1, 1]} : vector<16x6xf32> to vector<14x6xf32>
    %cst_12 = arith.constant dense<0.000000e+00> : vector<14x8xf32>
    %15 = tpu.matmul %14, %6, %cst_12 {dimension_numbers = #tpu.dot_dimension_numbers<[1], [0], [0], [1], [0, 0, 1, 1], [], []>} : vector<14x6xf32>, vector<6x8xf32>, vector<14x8xf32> -> vector<14x8xf32>
    %16 = arith.addf %13, %15 : vector<14x8xf32>
    %cst_13 = arith.constant dense<0xFF800000> : vector<8xf32>
    %17 = vector.multi_reduction <maximumf>, %16, %cst_13 [0] : vector<14x8xf32> to vector<8xf32>
    %18 = vector.shape_cast %17 : vector<8xf32> to vector<1x8xf32>
    %c1_14 = arith.constant 1 : index
    %c0_15 = arith.constant 0 : index
    %c0_16 = arith.constant 0 : index
    %19 = vector.load %arg0[%c1_14, %c0_15, %c0_16] : memref<2x16x6xf32, #tpu.memory_space<vmem>>, vector<1x16x6xf32>
    %20 = vector.shape_cast %19 : vector<1x16x6xf32> to vector<16x6xf32>
    %21 = vector.extract_strided_slice %20 {offsets = [0, 0], sizes = [14, 6], strides = [1, 1]} : vector<16x6xf32> to vector<14x6xf32>
    %cst_17 = arith.constant dense<0.000000e+00> : vector<14x8xf32>
    %22 = tpu.matmul %21, %2, %cst_17 {dimension_numbers = #tpu.dot_dimension_numbers<[1], [0], [0], [1], [0, 0, 1, 1], [], []>} : vector<14x6xf32>, vector<6x8xf32>, vector<14x8xf32> -> vector<14x8xf32>
    %23 = vector.extract_strided_slice %20 {offsets = [1, 0], sizes = [14, 6], strides = [1, 1]} : vector<16x6xf32> to vector<14x6xf32>
    %cst_18 = arith.constant dense<0.000000e+00> : vector<14x8xf32>
    %24 = tpu.matmul %23, %4, %cst_18 {dimension_numbers = #tpu.dot_dimension_numbers<[1], [0], [0], [1], [0, 0, 1, 1], [], []>} : vector<14x6xf32>, vector<6x8xf32>, vector<14x8xf32> -> vector<14x8xf32>
    %25 = arith.addf %22, %24 : vector<14x8xf32>
    %26 = vector.extract_strided_slice %20 {offsets = [2, 0], sizes = [14, 6], strides = [1, 1]} : vector<16x6xf32> to vector<14x6xf32>
    %cst_19 = arith.constant dense<0.000000e+00> : vector<14x8xf32>
    %27 = tpu.matmul %26, %6, %cst_19 {dimension_numbers = #tpu.dot_dimension_numbers<[1], [0], [0], [1], [0, 0, 1, 1], [], []>} : vector<14x6xf32>, vector<6x8xf32>, vector<14x8xf32> -> vector<14x8xf32>
    %28 = arith.addf %25, %27 : vector<14x8xf32>
    %cst_20 = arith.constant dense<0xFF800000> : vector<8xf32>
    %29 = vector.multi_reduction <maximumf>, %28, %cst_20 [0] : vector<14x8xf32> to vector<8xf32>
    %30 = vector.shape_cast %29 : vector<8xf32> to vector<1x8xf32>
    %31 = tpu.concatenate %18, %30 in 0 : vector<1x8xf32>, vector<1x8xf32> -> vector<2x8xf32>
    %32 = vector.broadcast %0 : vector<1x8xf32> to vector<2x8xf32>
    %33 = arith.addf %31, %32 : vector<2x8xf32>
    %cst_21 = arith.constant 0.000000e+00 : f32
    %34 = vector.broadcast %cst_21 : f32 to vector<2x8xf32>
    %35 = arith.maximumf %33, %34 : vector<2x8xf32>
    %c0_22 = arith.constant 0 : index
    %c0_23 = arith.constant 0 : index
    %36 = vector.load %arg3[%c0_22, %c0_23] : memref<2x8xf32, #tpu.memory_space<vmem>>, vector<2x8xf32>
    tpu.vector_store %arg3[%c0_22, %c0_23], %35 {strides = array<i32>} : memref<2x8xf32, #tpu.memory_space<vmem>>, vector<2x8xf32>,
    return
  }
}

</mosaic_0001>

<bundles_post_ra>
// kernel: tpu_custom_call.1
= control target key start
LH: loop header
LB: loop body
LE: loop exit
PB: predicated region body
PF: predicated region fallthrough
CT: control target
= control target key end

     0   :  { %vm34_vm0 = vcmask 1045504   ;;  %vm25_vm1 = vcmask 1046528   ;;  %vm29_vm2 = vcmask 48128   ;;  %s752_s0 = inlined_call_operand.vmem [shape: f32[2,16,6], index: 0, kind: input, shape index: {}]   ;;  %s753_s1 = inlined_call_operand.vmem [shape: f32[3,6,8], index: 1, kind: input, shape index: {}]   ;;  %s754_s2 = inlined_call_operand.vmem [shape: f32[1,8], index: 2, kind: input, shape index: {}]   ;;  %s755_s3 = inlined_call_operand.hbm [shape: f32[2,8], index: 3, kind: output, shape index: {}]  }
   0x1   :  { %v578_v0 = vld [vmem:[%s753_s1 + $0x8] sm:$0x3f]  ;;  %v16_v1 = vld [vmem:[%s753_s1] sm:$0x3f]  ;;  %v579_v5 = vld [vmem:[%s753_s1 + $0x10] sm:$0x3f] }
   0x2   :  { %v21_v2 = vld [vmem:[%s752_s0] sm:$0xff]  ;;  %619 = vmatprep.subr.msk.mxu0 %vm34_vm0, %v578_v0  ;;  %624 = vmatprep.subr.msk.mxu1 %vm34_vm0, %v16_v1  ;;  %v22_v3 = vld [vmem:[%s752_s0 + $0x8] sm:$0xff]  ;;  %v589_v9 = vld [vmem:[%s752_s0 + $0x10] sm:$0xff] }
   0x3   :  { %v26_v4 = vrot.slane %v21_v2, 1  ;;  %620 = vmatpush3.msk.msra.mxu0 %vm34_vm0, %v578_v0  ;;  %v27_v6 = vrot.slane %v22_v3, 1  ;;  %625 = vmatpush3.msk.msra.mxu1 %vm34_vm0, %v16_v1  ;;  %v195_v7 = vrot.slane %v21_v2, 2  ;;  %v196_v8 = vrot.slane %v22_v3, 2  ;;  %v590_v10 = vld [vmem:[%s752_s0 + $0x18] sm:$0xff] }
   0x4   :  { %626 = vmatprep.mubr.msk.f32.mxu1 %vm29_vm2, %v21_v2  ;;  %629 = vmatprep.subr.msk.mxu0 %vm34_vm0, %v579_v5  ;;  %v298_v11 = vrot.slane %v589_v9, 1  ;;  %v299_v12 = vrot.slane %v590_v10, 1  ;;  %v459_v13 = vrot.slane %v589_v9, 2  ;;  %v460_v14 = vrot.slane %v590_v10, 2 }
   0x5   :  { %8 = vsyncpa [#allocation3], 0  ;;  %v28_v15 = vsel %vm25_vm1, %v26_v4, %v27_v6  ;;  %627 = vmatmul.mubr.msk.f32.vlgmr.msra.gmra.mxu1 %vm29_vm2, %v22_v3  ;;  %634 = vmatprep.subr.msk.mxu1 %vm34_vm0, %v578_v0  ;;  %v197_v16 = vsel %vm34_vm0, %v195_v7, %v196_v8  ;;  %vm284_vm3 = vcmask 62464   ;;  %vm282_vm4 = vcmask 64512   ;;  %v600_v57 = vld [vmem:[%s754_s2] ss:$0 sm:$0xff] }
   0x6   :  { %621 = vmatprep.mubr.msk.f32.mxu0 %vm29_vm2, %v28_v15  ;;  %635 = vmatpush3.msk.msra.mxu1 %vm34_vm0, %v578_v0  ;;  %v300_v17 = vsel %vm25_vm1, %v298_v11, %v299_v12  ;;  %v461_v18 = vsel %vm34_vm0, %v459_v13, %v460_v14  ;;  %vm552_vm5 = vcmask 1040384   ;;  %s672_s26 = smov [#allocation2]   ;;  %vm562_vm6 = vcmask 58368  }
   0x7   :  { %622 = vmatmul.mubr.msk.f32.vlgmr.msra.gmra.mxu0 %vm29_vm2, %v27_v6  ;;  %636 = vmatprep.mubr.msk.f32.mxu1 %vm29_vm2, %v300_v17  ;;  %s570_s27 = sshll.u32 %s672_s26, 4  ;;  %s571_s27 = int_to_ptr.vmem [resolvable:$true] %s570_s27 }
   0x8   :  { %630 = vmatpush3.msk.msra.mxu0 %vm34_vm0, %v579_v5  ;;  %631 = vmatprep.mubr.msk.f32.mxu0 %vm29_vm2, %v197_v16  ;;  %s650_s28 = scalar_lea.vmem %s571_s27, 32  ;;  %p655_p1 = scmp.lt.s32.totalorder %s571_s27, %s571_s27 }
   0x9   :  { %639 = vmatprep.subr.msk.mxu0 %vm34_vm0, %v16_v1  ;;  %637 = vmatmul.mubr.msk.f32.vlgmr.msra.gmra.mxu1 %vm29_vm2, %v299_v12  ;;  %p651_p0 = scmp.ne.s32.totalorder %s571_s27, %s650_s28  ;;  %p656_p2 = scmp.lt.s32.totalorder %s650_s28, %s650_s28 }
   0xa   :  { %644 = vmatprep.subr.msk.mxu1 %vm34_vm0, %v579_v5  ;;  %646 = vmatprep.mubr.msk.f32.mxu1 %vm29_vm2, %v461_v18 }
   0xb   :  { %632 = vmatmul.mubr.msk.f32.vlgmr.msra.gmra.mxu0 %vm29_vm2, %v196_v8  ;;  %645 = vmatpush3.msk.msra.mxu1 %vm34_vm0, %v579_v5  ;;  %p657_p3 = por %p656_p2, %p655_p1 }
   0xc   :  { %640 = vmatpush3.msk.msra.mxu0 %vm34_vm0, %v16_v1  ;;  %641 = vmatprep.mubr.msk.f32.mxu0 %vm29_vm2, %v589_v9 }
   0xd   :  { %647 = vmatmul.mubr.msk.f32.vlgmr.msra.gmra.mxu1 %vm29_vm2, %v460_v14  ;;  %p658_p4 = pnand %p657_p3, %p651_p0 }
   0xf   :  { %642 = vmatmul.mubr.msk.f32.vlgmr.msra.gmra.mxu0 %vm29_vm2, %v590_v10 }
  0xc5   :  { %v628_v19 = vpop.f32.mrf.mxu1 }
  0xc7   :  { %v623_v20 = vpop.f32.mrf.mxu0  ;;  %v186_v21 = vpop.f32.mrf.mxu1 }
  0xc8   :  { %v192_v24 = vadd.f32 %v628_v19, %v623_v20 }
  0xc9   :  { %v104_v22 = vpop.f32.mrf.mxu0  ;;  %v638_v23 = vpop.f32.mrf.mxu1 }
  0xca   :  { %v187_v27 = vadd.f32 %v186_v21, %v104_v22 }
  0xcb   :  { %v633_v25 = vpop.f32.mrf.mxu0  ;;  %v371_v26 = vpop.f32.mrf.mxu1 }
  0xcc   :  { %v281_v28 = vadd.f32 %v633_v25, %v192_v24 }
  0xcd   :  { %v271_v29 = vpop.f32.mrf.mxu0  ;;  %v648_v32 = vpop.f32.mrf.mxu1 }
  0xce   :  { %v280_v30 = vadd.f32 %v271_v29, %v187_v27  ;;  %v285_v33 = vsel %vm284_vm3, %v281_v28, -inf }
  0xcf   :  { %v643_v31 = vpop.f32.mrf.mxu0  ;;  %v532_v41 = vpop.f32.mrf.mxu1 }
  0xd0   :  { %v283_v34 = vsel %vm282_vm4, %v280_v30, -inf  ;;  %v456_v35 = vadd.f32 %v643_v31, %v638_v23 }
  0xd1   :  { %v286_v36 = vmax.f32 %v283_v34, %v285_v33  ;;  %v450_v37 = vpop.f32.mrf.mxu0 }
  0xd2   :  { %v542_v38 = vadd.f32 %v648_v32, %v456_v35  ;;  %v451_v39 = vadd.f32 %v450_v37, %v371_v26 }
  0xd3   :  { %v287_v40 = vrot.slane %v286_v36, 4 }
  0xd4   :  { %v541_v42 = vadd.f32 %v532_v41, %v451_v39  ;;  %v544_v44 = vsel %vm284_vm3, %v542_v38, -inf }
  0xd5   :  { %v288_v43 = vmax.f32 %v286_v36, %v287_v40 }
  0xd6   :  { %v543_v45 = vsel %vm282_vm4, %v541_v42, -inf }
  0xd7   :  { %v289_v46 = vrot.slane %v288_v43, 2  ;;  %v545_v47 = vmax.f32 %v543_v45, %v544_v44 }
  0xd9   :  { %v546_v48 = vrot.slane %v545_v47, 4  ;;  %v290_v49 = vmax.f32 %v288_v43, %v289_v46 }
  0xdb   :  { %v547_v50 = vmax.f32 %v545_v47, %v546_v48  ;;  %v291_v52 = vrot.slane %v290_v49, 1 }
  0xdd   :  { %v548_v51 = vrot.slane %v547_v50, 2  ;;  %v292_v55 = vmax.f32 %v290_v49, %v291_v52 }
  0xdf   :  { %v549_v53 = vmax.f32 %v547_v50, %v548_v51 }
  0xe1   :  { %v550_v54 = vrot.slane %v549_v53, 1 }
  0xe3   :  { %v551_v56 = vmax.f32 %v549_v53, %v550_v54 }
  0xe5   :  { %v553_v58 = vsel %vm552_vm5, %v292_v55, %v551_v56 }
  0xe6   :  { %v560_v59 = vadd.f32 %v600_v57, %v553_v58 }
  0xe8   :  { %v561_v60 = vmax.f32 %v560_v59, 0.0 }
  0xea   :  { %563 = vst.msk [vmem:[#allocation2] sm:$0x3] %vm562_vm6, %v561_v60 }
  0xeb   :  { %661 = shalt.err (!%p658_p4)
}
  0xec   :  { %573 = dma.vmem_to_hbm [thread:$0]  %s571_s27, 32, %s755_s3, [#allocation3]  }
  0xed   :  { %670 = dma.done.wait [#allocation3], 32  }
  0xee   :  { %671 = vsyncadd [#allocation3], 4294967264 }
  0xef   :  { %577 = vsyncpa [#allocation3], 1 }

</bundles_post_ra>
